<compile_context>
chip_gen: v7x
topology: tpu7x:2x2x1
jax: 0.10.0
libtpu: 0.0.40
codegen_flags: <defaults>
</compile_context>

<pallas_src>
import jax
import jax.numpy as jnp
import numpy as np
from jax.experimental import pallas as pl
from jax.experimental.pallas import tpu as pltpu

EPS = 1e-5      # nn.BatchNorm2d default eps
LANE = 128      # TPU lane width


# ----------------------------- Pallas kernels -----------------------------

def time_mlp_kernel(t_ref, wt_ref, bt_ref, o_ref):
    """relu(t @ Wt + bt)  -- tiny (N, C) result, computed once."""
    te = jnp.dot(t_ref[...], wt_ref[...], preferred_element_type=jnp.float32)
    o_ref[...] = jnp.maximum(te + bt_ref[...], 0.0)


def conv_relu_stats_kernel(xcol_ref, w_ref, b_ref, h_ref, stats_ref):
    """Pass 1 of conv+BN: matmul + bias + ReLU; emit per-tile sum / sum-sq."""
    h = jnp.dot(xcol_ref[...], w_ref[...], preferred_element_type=jnp.float32)
    h = jnp.maximum(h + b_ref[...], 0.0)
    h_ref[...] = h
    s = jnp.sum(h, axis=0, keepdims=True)            # (1, C)   (XLU, hidden)
    ss = jnp.sum(h * h, axis=0, keepdims=True)       # (1, C)
    stats_ref[...] = jnp.concatenate([s, ss], axis=0)[None]


def bn_time_kernel(h_ref, scale_ref, shiftb_ref, o_ref):
    """Pass 2 (conv1): fused BN scale + per-sample (shift + time-emb) add."""
    o_ref[...] = h_ref[...] * scale_ref[...] + shiftb_ref[...]


def bn_time_mk_kernel(h_ref, scale_ref, shiftb_ref, mk_ref, o_ref):
    """Pass 2 (conv1) variant with makeup_features add."""
    o_ref[...] = h_ref[...] * scale_ref[...] + shiftb_ref[...] + mk_ref[...]


def bn_apply_kernel(h_ref, scale_ref, shift_ref, o_ref):
    """Pass 2 (conv2): fused BN scale/shift."""
    o_ref[...] = h_ref[...] * scale_ref[...] + shift_ref[...]


def matmul_bias_kernel(xcol_ref, w_ref, b_ref, o_ref):
    """transform conv (4x4 stride 2, as matmul) + bias."""
    o_ref[...] = (jnp.dot(xcol_ref[...], w_ref[...],
                          preferred_element_type=jnp.float32) + b_ref[...])


# ------------------------------- helpers -----------------------------------

def _round_up(x, m):
    return (x + m - 1) // m * m


def _pad_last(a, to):
    pad = to - a.shape[-1]
    if pad == 0:
        return a
    return jnp.pad(a, [(0, 0)] * (a.ndim - 1) + [(0, pad)])


def _pick_row_tile(rows, target):
    """Largest multiple of 8 that divides `rows` and is <= target."""
    if rows % 8 != 0:
        return rows                      # single full-extent block
    t = min(_round_up(target, 8), rows)
    t -= t % 8
    while rows % t:
        t -= 8
    return t


def im2col(x, kh, kw, stride, pad):
    """x: (N,H,W,C) NHWC -> (N*Ho*Wo, kh*kw*C), plus output spatial shape."""
    N, H, W, C = x.shape
    Ho = (H + 2 * pad - kh) // stride + 1
    Wo = (W + 2 * pad - kw) // stride + 1
    xp = jnp.pad(x, ((0, 0), (pad, pad), (pad, pad), (0, 0)))
    cols = []
    for ky in range(kh):
        for kx in range(kw):
            cols.append(xp[:, ky:ky + stride * (Ho - 1) + 1:stride,
                           kx:kx + stride * (Wo - 1) + 1:stride, :])
    patches = jnp.stack(cols, axis=3)                # (N, Ho, Wo, kh*kw, C)
    return patches.reshape(N * Ho * Wo, kh * kw * C), (Ho, Wo)


# --------------------------- gridded pallas calls ---------------------------

def _time_mlp(t, wtk, btk):
    n = t.shape[0]
    cp = wtk.shape[-1]
    return pl.pallas_call(
        time_mlp_kernel,
        out_shape=jax.ShapeDtypeStruct((n, cp), jnp.float32),
        in_specs=[pl.BlockSpec(memory_space=pltpu.MemorySpace.VMEM)] * 3,
        out_specs=pl.BlockSpec(memory_space=pltpu.MemorySpace.VMEM),
    )(t, wtk, btk)


def _conv_relu_stats(xcol, w, b, row_tile, mxu_dtype):
    rows, k = xcol.shape
    cp = w.shape[-1]
    tm = _pick_row_tile(rows, row_tile)
    ntiles = rows // tm
    return pl.pallas_call(
        conv_relu_stats_kernel,
        out_shape=(jax.ShapeDtypeStruct((rows, cp), jnp.float32),
                   jax.ShapeDtypeStruct((ntiles, 2, cp), jnp.float32)),
        grid=(ntiles,),
        in_specs=[pl.BlockSpec((tm, k), lambda i: (i, 0)),
                  pl.BlockSpec((k, cp), lambda i: (0, 0)),
                  pl.BlockSpec((1, cp), lambda i: (0, 0))],
        out_specs=(pl.BlockSpec((tm, cp), lambda i: (i, 0)),
                   pl.BlockSpec((1, 2, cp), lambda i: (i, 0, 0))),
        compiler_params=pltpu.CompilerParams(
            dimension_semantics=("parallel",)),
    )(xcol, w.astype(mxu_dtype), b)


def _bn_scale_shift(stats, rows, gamma, beta, cp):
    """Fold per-tile sums into per-channel affine: scale*h + shift == BN(h)."""
    s = jnp.sum(stats[:, 0, :], axis=0)
    ss = jnp.sum(stats[:, 1, :], axis=0)
    mean = s / rows
    var = jnp.maximum(ss / rows - mean * mean, 0.0)
    g = _pad_last(gamma.reshape(1, -1), cp)[0]       # zero on pad channels
    be = _pad_last(beta.reshape(1, -1), cp)[0]
    scale = g * jax.lax.rsqrt(var + EPS)
    shift = be - mean * scale
    return scale.reshape(1, cp), shift.reshape(1, cp)


def _bn_time_apply(h, scale, shift_b, mk, n, hw, cp, row_tile):
    """h: (rows, cp); shift_b: (n, cp) per-sample shift (BN shift + time emb)."""
    h3 = h.reshape(n, hw, cp)
    tmb = _pick_row_tile(hw, row_tile)
    grid = (n, hw // tmb)
    h_spec = pl.BlockSpec((1, tmb, cp), lambda b, i: (b, i, 0))
    vec_spec = pl.BlockSpec((1, cp), lambda b, i: (0, 0))
    shiftb_spec = pl.BlockSpec((1, cp), lambda b, i: (b, 0))
    if mk is None:
        kernel = bn_time_kernel
        in_specs = [h_spec, vec_spec, shiftb_spec]
        args = (h3, scale, shift_b)
    else:
        kernel = bn_time_mk_kernel
        in_specs = [h_spec, vec_spec, shiftb_spec, h_spec]
        args = (h3, scale, shift_b, mk.reshape(n, hw, cp))
    return pl.pallas_call(
        kernel,
        out_shape=jax.ShapeDtypeStruct((n, hw, cp), jnp.float32),
        grid=grid,
        in_specs=in_specs,
        out_specs=h_spec,
        compiler_params=pltpu.CompilerParams(
            dimension_semantics=("parallel", "parallel")),
    )(*args)


def _bn_apply(h, scale, shift, row_tile):
    rows, cp = h.shape
    tm = _pick_row_tile(rows, row_tile)
    return pl.pallas_call(
        bn_apply_kernel,
        out_shape=jax.ShapeDtypeStruct((rows, cp), jnp.float32),
        grid=(rows // tm,),
        in_specs=[pl.BlockSpec((tm, cp), lambda i: (i, 0)),
                  pl.BlockSpec((1, cp), lambda i: (0, 0)),
                  pl.BlockSpec((1, cp), lambda i: (0, 0))],
        out_specs=pl.BlockSpec((tm, cp), lambda i: (i, 0)),
        compiler_params=pltpu.CompilerParams(
            dimension_semantics=("parallel",)),
    )(h, scale, shift)


def _matmul_bias(xcol, w, b, row_tile, mxu_dtype):
    rows, k = xcol.shape
    cp = w.shape[-1]
    tm = _pick_row_tile(rows, row_tile)
    return pl.pallas_call(
        matmul_bias_kernel,
        out_shape=jax.ShapeDtypeStruct((rows, cp), jnp.float32),
        grid=(rows // tm,),
        in_specs=[pl.BlockSpec((tm, k), lambda i: (i, 0)),
                  pl.BlockSpec((k, cp), lambda i: (0, 0)),
                  pl.BlockSpec((1, cp), lambda i: (0, 0))],
        out_specs=pl.BlockSpec((tm, cp), lambda i: (i, 0)),
        compiler_params=pltpu.CompilerParams(
            dimension_semantics=("parallel",)),
    )(xcol, w.astype(mxu_dtype), b)


# ------------------------------- forward pass -------------------------------

def unet_block_forward(x_nchw, t, p, makeup_features=None,
                       row_tile=512, mxu_dtype=jnp.float32):
    """UNetBlock (up=False) forward. x_nchw: (N, Cin, H, W), t: (N, Temb).

    row_tile: target rows of the im2col matrices per grid step (512-2048 for
    real sizes; use ~half on v7x for its 64 MiB VMEM).  mxu_dtype=bfloat16
    halves matmul-operand DMA bytes on v6e/v7x (f32 accumulation kept).
    """
    x = jnp.transpose(x_nchw, (0, 2, 3, 1)).astype(jnp.float32)   # NCHW -> NHWC
    N, H, W, Cin = x.shape
    Cout = p["w1"].shape[-1]
    Cp = _round_up(Cout, LANE)   # lane-dense channel dim (no-op for Cout >= 128)
    rows = N * H * W

    # Weights / per-channel vectors padded to the lane width with zeros, so
    # padded output channels stay exactly zero through every stage.
    w1k = _pad_last(p["w1"].reshape(9 * Cin, Cout), Cp)
    b1k = _pad_last(p["b1"].reshape(1, Cout), Cp)
    wtk = _pad_last(p["wt"], Cp)
    btk = _pad_last(p["bt"].reshape(1, Cout), Cp)
    w2k = _pad_last(p["w2"].reshape(9 * Cout, Cout), Cp)
    b2k = _pad_last(p["b2"].reshape(1, Cout), Cp)
    w3k = _pad_last(p["w3"].reshape(16 * Cout, Cout), Cp)
    b3k = _pad_last(p["b3"].reshape(1, Cout), Cp)

    # time embedding relu(t @ Wt + bt): (N, Cp), computed once (no selector matmul)
    te = _time_mlp(t.astype(jnp.float32), wtk, btk)

    # --- conv1 (3x3, pad 1) + ReLU + BN1 + time add (+ optional makeup) ---
    # Cast BEFORE im2col so the patch matrix materializes at MXU width.
    xcol, _ = im2col(x.astype(mxu_dtype), 3, 3, 1, 1)             # (rows, 9*Cin)
    h1p, st1 = _conv_relu_stats(xcol, w1k, b1k, row_tile, mxu_dtype)
    sc1, sh1 = _bn_scale_shift(st1, rows, p["g1"], p["be1"], Cp)
    shift_b = sh1 + te                                            # (N, Cp) tiny
    mk = None
    if makeup_features is not None:
        mk = _pad_last(jnp.transpose(makeup_features, (0, 2, 3, 1))
                       .astype(jnp.float32), Cp)
    h1 = _bn_time_apply(h1p, sc1, shift_b, mk, N, H * W, Cp, row_tile)
    h1 = h1.reshape(N, H, W, Cp)[..., :Cout]         # drop lane padding

    # --- conv2 (3x3, pad 1) + ReLU + BN2 ---
    x2col, _ = im2col(h1.astype(mxu_dtype), 3, 3, 1, 1)           # (rows, 9*Cout)
    h2p, st2 = _conv_relu_stats(x2col, w2k, b2k, row_tile, mxu_dtype)
    sc2, sh2 = _bn_scale_shift(st2, rows, p["g2"], p["be2"], Cp)
    h2 = _bn_apply(h2p, sc2, sh2, row_tile)
    h2 = h2.reshape(N, H, W, Cp)[..., :Cout]

    # --- transform: Conv2d(out_ch, out_ch, 4, stride 2, pad 1) ---
    x3col, (Ho, Wo) = im2col(h2.astype(mxu_dtype), 4, 4, 2, 1)    # (N*Ho*Wo, 16*Cout)
    out = _matmul_bias(x3col, w3k, b3k, row_tile, mxu_dtype)
    out = out.reshape(N, Ho, Wo, Cp)[..., :Cout]
    return jnp.transpose(out, (0, 3, 1, 2))                       # NHWC -> NCHW


# ----------------------------- pure-JAX reference ---------------------------

def reference_forward(x_nchw, t, p, makeup_features=None):
    x = jnp.transpose(x_nchw, (0, 2, 3, 1)).astype(jnp.float32)

    def conv(x, w, b, stride, pad):
        y = jax.lax.conv_general_dilated(
            x, w, window_strides=(stride, stride),
            padding=[(pad, pad), (pad, pad)],
            dimension_numbers=("NHWC", "HWIO", "NHWC"))
        return y + b.reshape(1, 1, 1, -1)

    def bn(h, g, b):
        m = jnp.mean(h, axis=(0, 1, 2), keepdims=True)
        v = jnp.mean((h - m) ** 2, axis=(0, 1, 2), keepdims=True)
        return (h - m) * jax.lax.rsqrt(v + EPS) * g.reshape(1, 1, 1, -1) \
            + b.reshape(1, 1, 1, -1)

    h = bn(jnp.maximum(conv(x, p["w1"], p["b1"], 1, 1), 0.0), p["g1"], p["be1"])
    te = jnp.maximum(t @ p["wt"] + p["bt"], 0.0)
    h = h + te[:, None, None, :]
    if makeup_features is not None:
        h = h + jnp.transpose(makeup_features, (0, 2, 3, 1))
    h = bn(jnp.maximum(conv(h, p["w2"], p["b2"], 1, 1), 0.0), p["g2"], p["be2"])
    out = conv(h, p["w3"], p["b3"], 2, 1)
    return jnp.transpose(out, (0, 3, 1, 2))


# ---------------------------------- main ------------------------------------

if __name__ == "__main__":
    N, Cin, Cout, Temb, H = 2, 4, 8, 32, 16

    ks = jax.random.split(jax.random.PRNGKey(0), 12)
    p = {
        "w1": 0.1 * jax.random.normal(ks[0], (3, 3, Cin, Cout), jnp.float32),
        "b1": 0.1 * jax.random.normal(ks[1], (Cout,), jnp.float32),
        "wt": 0.1 * jax.random.normal(ks[2], (Temb, Cout), jnp.float32),
        "bt": 0.1 * jax.random.normal(ks[3], (Cout,), jnp.float32),
        "g1": 1.0 + 0.1 * jax.random.normal(ks[4], (Cout,), jnp.float32),
        "be1": 0.1 * jax.random.normal(ks[5], (Cout,), jnp.float32),
        "w2": 0.1 * jax.random.normal(ks[6], (3, 3, Cout, Cout), jnp.float32),
        "b2": 0.1 * jax.random.normal(ks[7], (Cout,), jnp.float32),
        "g2": 1.0 + 0.1 * jax.random.normal(ks[8], (Cout,), jnp.float32),
        "be2": 0.1 * jax.random.normal(ks[9], (Cout,), jnp.float32),
        "w3": 0.1 * jax.random.normal(ks[10], (4, 4, Cout, Cout), jnp.float32),
        "b3": 0.1 * jax.random.normal(ks[11], (Cout,), jnp.float32),
    }
    kx, kt, km = jax.random.split(jax.random.PRNGKey(1), 3)
    x = jax.random.normal(kx, (N, Cin, H, H), jnp.float32)   # NCHW like PyTorch
    t = jax.random.normal(kt, (N, Temb), jnp.float32)
    mkf = 0.1 * jax.random.normal(km, (N, Cout, H, H), jnp.float32)

    ref = jax.block_until_ready(reference_forward(x, t, p))

    # f32 MXU path; row_tile=128 forces multi-step grids at this toy size so
    # the cross-tile (two-pass) BatchNorm statistics are exercised.
    out = jax.block_until_ready(unet_block_forward(x, t, p, row_tile=128))
    assert out.shape == (N, Cout, H // 2, H // 2), out.shape
    np.testing.assert_allclose(np.asarray(out), np.asarray(ref),
                               atol=2e-3, rtol=2e-3)

    # makeup_features branch.
    ref_mk = jax.block_until_ready(
        reference_forward(x, t, p, makeup_features=mkf))
    out_mk = jax.block_until_ready(
        unet_block_forward(x, t, p, makeup_features=mkf, row_tile=128))
    np.testing.assert_allclose(np.asarray(out_mk), np.asarray(ref_mk),
                               atol=2e-3, rtol=2e-3)

    # bf16 MXU-operand fast path (v6e/v7x): f32 accumulation, looser tolerance.
    out_bf16 = jax.block_until_ready(
        unet_block_forward(x, t, p, row_tile=128, mxu_dtype=jnp.bfloat16))
    np.testing.assert_allclose(np.asarray(out_bf16), np.asarray(ref),
                               atol=5e-2, rtol=5e-2)

    print("KERNEL_OK")
</pallas_src>

<mosaic_0001>
module attributes {stable_mosaic.version = 11 : i64} {
  func.func @time_mlp_kernel(%arg0: memref<2x32xf32, #tpu.memory_space<vmem>>, %arg1: memref<32x128xf32, #tpu.memory_space<vmem>>, %arg2: memref<1x128xf32, #tpu.memory_space<vmem>>, %arg3: memref<2x128xf32, #tpu.memory_space<vmem>>) attributes {dimension_semantics = [], scalar_prefetch = 0 : i64, scratch_operands = 0 : i64, tpu.core_type = #tpu.core_type<tc>} {
    %c0 = arith.constant 0 : index
    %c0_0 = arith.constant 0 : index
    %0 = vector.load %arg0[%c0, %c0_0] : memref<2x32xf32, #tpu.memory_space<vmem>>, vector<2x32xf32>
    %c0_1 = arith.constant 0 : index
    %c0_2 = arith.constant 0 : index
    %1 = vector.load %arg1[%c0_1, %c0_2] : memref<32x128xf32, #tpu.memory_space<vmem>>, vector<32x128xf32>
    %cst = arith.constant dense<0.000000e+00> : vector<2x128xf32>
    %2 = tpu.matmul %0, %1, %cst {dimension_numbers = #tpu.dot_dimension_numbers<[1], [0], [0], [1], [0, 0, 1, 1], [], []>} : vector<2x32xf32>, vector<32x128xf32>, vector<2x128xf32> -> vector<2x128xf32>
    %c0_3 = arith.constant 0 : index
    %c0_4 = arith.constant 0 : index
    %3 = vector.load %arg2[%c0_3, %c0_4] : memref<1x128xf32, #tpu.memory_space<vmem>>, vector<1x128xf32>
    %4 = vector.broadcast %3 : vector<1x128xf32> to vector<2x128xf32>
    %5 = arith.addf %2, %4 : vector<2x128xf32>
    %cst_5 = arith.constant 0.000000e+00 : f32
    %6 = vector.broadcast %cst_5 : f32 to vector<2x128xf32>
    %7 = arith.maximumf %5, %6 : vector<2x128xf32>
    %c0_6 = arith.constant 0 : index
    %c0_7 = arith.constant 0 : index
    %8 = vector.load %arg3[%c0_6, %c0_7] : memref<2x128xf32, #tpu.memory_space<vmem>>, vector<2x128xf32>
    tpu.vector_store %arg3[%c0_6, %c0_7], %7 {strides = array<i32>} : memref<2x128xf32, #tpu.memory_space<vmem>>, vector<2x128xf32>,
    return
  }
}

</mosaic_0001>

<bundles_post_ra>
// kernel: tpu_custom_call.1
= control target key start
LH: loop header
LB: loop body
LE: loop exit
PB: predicated region body
PF: predicated region fallthrough
CT: control target
= control target key end

     0   :  { %8 = vsyncpa [#allocation3], 0  ;;  %s323_s0 = inlined_call_operand.hbm [shape: f32[2,32], index: 0, kind: input, shape index: {}]   ;;  %s324_s1 = inlined_call_operand.hbm [shape: f32[32,128], index: 1, kind: input, shape index: {}]   ;;  %s325_s2 = inlined_call_operand.vmem [shape: f32[1,128], index: 2, kind: input, shape index: {}]   ;;  %s326_s3 = inlined_call_operand.hbm [shape: f32[2,128], index: 3, kind: output, shape index: {}]  }
   0x1   :  { %9 = vsyncpa [#allocation6], 0 }
   0x2   :  { %10 = vsyncpa [#allocation4], 0  ;;  %s249_s12 = smov [#allocation2]   ;;  %s250_s14 = smov [#allocation5]  }
   0x3   :  { %s17_s13 = sshll.u32 %s249_s12, 4  ;;  %s26_s15 = sshll.u32 %s250_s14, 4  ;;  %s18_s13 = int_to_ptr.vmem [resolvable:$true] %s17_s13  ;;  %s277_s15 = int_to_ptr.vmem [resolvable:$true] %s26_s15 }
   0x4   :  { %s177_s18 = scalar_lea.hbm %s323_s0, 32 }
   0x5   :  { %p178_p0 = scmp.ne.s32.totalorder %s323_s0, %s177_s18  ;;  %p181_p1 = scmp.lt.u32.totalorder %s177_s18, %s323_s0 }
   0x7   :  { %p183_p2 = pnand %p181_p1, %p178_p0 }
   0x9   :  { %186 = shalt.err (!%p183_p2)
}
   0xa   :  { %s187_s23 = scalar_lea.vmem %s18_s13, 32  ;;  %p192_p4 = scmp.lt.s32.totalorder %s18_s13, %s18_s13 }
   0xb   :  { %p188_p3 = scmp.ne.s32.totalorder %s18_s13, %s187_s23  ;;  %p193_p5 = scmp.lt.s32.totalorder %s187_s23, %s187_s23 }
   0xd   :  { %p194_p6 = por %p193_p5, %p192_p4 }
   0xf   :  { %p195_p7 = pnand %p194_p6, %p188_p3 }
  0x11   :  { %198 = shalt.err (!%p195_p7)
}
  0x12   :  { %20 = dma.hbm_to_vmem [thread:$0]  %s323_s0, 32, %s18_s13, [#allocation3]  }
  0x13   :  { %s199_s28 = scalar_lea.hbm %s324_s1, 512 }
  0x14   :  { %p200_p8 = scmp.ne.s32.totalorder %s324_s1, %s199_s28  ;;  %p203_p9 = scmp.lt.u32.totalorder %s199_s28, %s324_s1 }
  0x16   :  { %p205_p10 = pnand %p203_p9, %p200_p8 }
  0x18   :  { %208 = shalt.err (!%p205_p10)
}
  0x19   :  { %s209_s6 = scalar_lea.vmem %s277_s15, 512  ;;  %p214_p12 = scmp.lt.s32.totalorder %s277_s15, %s277_s15 }
  0x1a   :  { %p210_p11 = scmp.ne.s32.totalorder %s277_s15, %s209_s6  ;;  %p215_p13 = scmp.lt.s32.totalorder %s209_s6, %s209_s6 }
  0x1c   :  { %p216_p0 = por %p215_p13, %p214_p12 }
  0x1e   :  { %p217_p1 = pnand %p216_p0, %p210_p11 }
  0x20   :  { %220 = shalt.err (!%p217_p1)
}
  0x21   :  { %s251_s0 = smov 128   ;;  %s252_s7 = smov 8  }
  0x22   :  { %32 = dma.hbm_to_vmem [thread:$0]  %s324_s1, 512, %s277_s15, [#allocation6], %s251_s0, %s251_s0, %s252_s7  }
  0x23   :  { %243 = dma.done.wait [#allocation3], 32  }
  0x24   :  { %244 = vsyncadd [#allocation3], 4294967264 }
  0x25   :  { %245 = dma.done.wait [#allocation6], 512  }
  0x26   :  { %246 = vsyncadd [#allocation6], 4294966784  ;;  %v253_v0 = vmov 0.0|0.0   ;;  %vm254_vm0 = vmmov 0   ;;  %v255_v1 = vmov 0.0   ;;  %v42_v2 = vld [vmem:[#allocation5] sm:$0xff] }
  0x27   :  { %163 = vmatprep.subr.bf16.mxu0 %v253_v0  ;;  %160 = vmatprep.mubr.msk.f32.mxu0 %vm254_vm0, %v255_v1  ;;  %v43_v3 = vld [vmem:[#allocation5 + $0x8] sm:$0xff]  ;;  %v44_v4 = vld [vmem:[#allocation5 + $0x10] sm:$0xff]  ;;  %v45_v6 = vld [vmem:[#allocation5 + $0x18] sm:$0xff]  ;;  %vm53_vm1 = vcmask 261120   ;;  %s256_s11 = smov [#allocation7]  }
  0x28   :  { %v164_v5 = vpack.c.bf16 %v43_v3, %v42_v2  ;;  %v167_v7 = vpack.c.bf16 %v45_v6, %v44_v4  ;;  %v41_v8 = vld [vmem:[#allocation2] sm:$0x3]  ;;  %s135_s12 = sshll.u32 %s256_s11, 4  ;;  %s136_s12 = int_to_ptr.vmem [resolvable:$true] %s135_s12 }
  0x29   :  { %v145_v9 = vld [vmem:[%s325_s2] ss:$0 sm:$0xff]  ;;  %s221_s13 = scalar_lea.vmem %s136_s12, 32  ;;  %p226_p3 = scmp.lt.s32.totalorder %s136_s12, %s136_s12 }
  0x2a   :  { %165 = vmatpush3.bf16.msra.mxu0 %v164_v5  ;;  %p222_p2 = scmp.ne.s32.totalorder %s136_s12, %s221_s13  ;;  %p227_p4 = scmp.lt.s32.totalorder %s221_s13, %s221_s13 }
  0x2b   :  { %166 = vmatprep.subr.bf16.mxu0 %v253_v0 }
  0x2c   :  { %p228_p5 = por %p227_p4, %p226_p3 }
  0x2e   :  { %168 = vmatpush3.bf16.msra.mxu0 %v167_v7  ;;  %p229_p6 = pnand %p228_p5, %p222_p2 }
  0x31   :  { %161 = vmatmul.mubr.msk.f32.vlgmr.msra.gmra.mrb[0].mxu0 %vm53_vm1, %v41_v8 }
 0x104   :  { %v123_v10 = vpop.f32.mrb[0].mxu0 }
 0x105   :  { %v124_v11 = vadd.f32 %v145_v9, %v123_v10  ;;  %v162_v12 = vpop.f32.mrb[1].mxu0 }
 0x107   :  { %v127_v13 = vmax.f32 %v124_v11, 0.0 }
 0x109   :  { %128 = vst [vmem:[#allocation7] sm:$0x3] %v127_v13 }
 0x10a   :  { %232 = shalt.err (!%p229_p6)
}
 0x10b   :  { %s233_s16 = scalar_lea.hbm %s326_s3, 32 }
 0x10c   :  { %p234_p7 = scmp.ne.s32.totalorder %s326_s3, %s233_s16  ;;  %p237_p8 = scmp.lt.u32.totalorder %s233_s16, %s326_s3 }
 0x10e   :  { %p239_p9 = pnand %p237_p8, %p234_p7 }
 0x110   :  { %242 = shalt.err (!%p239_p9)
}
 0x111   :  { %138 = dma.vmem_to_hbm [thread:$0]  %s136_s12, 32, %s326_s3, [#allocation4]  }
 0x112   :  { %247 = dma.done.wait [#allocation4], 32  }
 0x113   :  { %248 = vsyncadd [#allocation4], 4294967264 }
 0x114   :  { %142 = vsyncpa [#allocation3], 1 }
 0x115   :  { %143 = vsyncpa [#allocation6], 1 }
 0x116   :  { %144 = vsyncpa [#allocation4], 1 }

</bundles_post_ra>
